<compile_context>
chip_gen: v6e
topology: v6e:2x2x1
jax: 0.10.0
libtpu: 0.0.40
codegen_flags: <defaults>
</compile_context>

<pallas_src>
import functools

import jax
import jax.numpy as jnp
from jax.experimental import pallas as pl
from jax.experimental.pallas import tpu as pltpu

_LANES = 128


def _taylor_softmax_kernel(x_ref, o_ref, *, n):
    # x_ref / o_ref: (1, C, tile_rows, 128) tile. Internal math in f32.
    x = x_ref[...].astype(jnp.float32)
    if n == 2:
        # Horner form of 1 + x + x^2/2.
        fn = x * (0.5 * x + 1.0) + 1.0
    else:
        fn = jnp.ones_like(x)
        term = jnp.ones_like(x)
        scale = 1.0
        for i in range(1, n + 1):
            scale /= float(i)        # 1 / i!
            term = term * x          # x^i
            fn = fn + term * scale
    # Channel reduction: C is a leading axis -> dense VPU adds, no XLU.
    denom = jnp.sum(fn, axis=1, keepdims=True)       # (1, 1, tile_rows, 128)
    # EUP vrcp (free slot) + one Newton-Raphson step -> ~f32 accuracy.
    inv = pl.reciprocal(denom, approx=True)
    inv = inv * (2.0 - denom * inv)
    o_ref[...] = (fn * inv).astype(o_ref.dtype)


def _vmem_budget():
    """(per-step tile byte budget, vmem_limit_bytes) per TPU generation."""
    cap = None
    try:
        cap = pltpu.get_tpu_info().vmem_capacity_bytes
    except Exception:
        cap = None
    if cap is not None and cap > 96 * 1024 * 1024:
        # v5e / v6e: 128 MiB physical VMEM -> bigger tiles, fewer grid steps.
        return 24 * 1024 * 1024, 96 * 1024 * 1024
    # v7x (64 MiB VMEM per TC) or unknown: conservative budget.
    return 12 * 1024 * 1024, 48 * 1024 * 1024


def _choose_tile_rows(batch, C, S, dtype_bytes, min_rows, tile_budget):
    """Pick a sublane-aligned spatial tile height from a VMEM byte budget."""
    if S <= min_rows:
        return S                 # single full-extent block (equals array dim)
    # Per 128-lane row across all C channels we hold:
    #   2x double-buffered input + 2x double-buffered output blocks
    #   + ~2 tile-sized f32 live temporaries (the upcast x and fn).
    bytes_per_row = C * _LANES * (4 * dtype_bytes + 2 * 4)
    tile_rows = (tile_budget // bytes_per_row) // min_rows * min_rows
    tile_rows = max(min_rows, tile_rows)
    rows_aligned = pl.cdiv(S, min_rows) * min_rows
    tile_rows = min(tile_rows, rows_aligned)
    # Keep both v7x TensorCores fed with >= 2 pipelined grid steps each.
    min_grid_steps = 4
    if batch * pl.cdiv(S, tile_rows) < min_grid_steps:
        tiles_per_batch = pl.cdiv(min_grid_steps, batch)
        capped = max(min_rows,
                     pl.cdiv(pl.cdiv(S, tiles_per_batch), min_rows) * min_rows)
        tile_rows = min(tile_rows, capped)
    return tile_rows


def taylor_softmax(x, dim=1, n=2):
    """Pallas TaylorSoftmax; matches torch TaylorSoftmax(dim=1, n=n).forward."""
    assert n % 2 == 0
    assert dim == 1, "kernel implemented for channel-axis reduction (dim=1)"
    B, C, H, W = x.shape
    HW = H * W
    dtype_bytes = jnp.dtype(x.dtype).itemsize
    min_rows = {4: 8, 2: 16, 1: 32}.get(dtype_bytes, 8)

    # Pad only up to a 128-lane multiple (needed for the (S, 128) reshape).
    # tile_rows alignment is handled by Pallas ragged last blocks instead of a
    # host-side pad/slice HBM round trip.
    hw_pad = pl.cdiv(HW, _LANES) * _LANES
    x2 = x.reshape(B, C, HW)
    if hw_pad != HW:
        # fn(0) = 1 > 0, so padded lanes keep a positive denominator.
        x2 = jnp.pad(x2, ((0, 0), (0, 0), (0, hw_pad - HW)))
    S = hw_pad // _LANES
    x4 = x2.reshape(B, C, S, _LANES)

    tile_budget, vmem_limit = _vmem_budget()
    tile_rows = _choose_tile_rows(B, C, S, dtype_bytes, min_rows, tile_budget)
    grid = (B, pl.cdiv(S, tile_rows))
    block = (1, C, tile_rows, _LANES)

    elements = B * C * S * _LANES
    cost = pl.CostEstimate(
        flops=elements * (2 * n + 2) + B * S * _LANES * (C + 3),
        transcendentals=B * S * _LANES,
        bytes_accessed=2 * elements * dtype_bytes,
    )

    out = pl.pallas_call(
        functools.partial(_taylor_softmax_kernel, n=n),
        out_shape=jax.ShapeDtypeStruct((B, C, S, _LANES), x.dtype),
        grid_spec=pltpu.PrefetchScalarGridSpec(
            num_scalar_prefetch=0,
            grid=grid,
            in_specs=[pl.BlockSpec(block, lambda b, s: (b, 0, s, 0))],
            out_specs=pl.BlockSpec(block, lambda b, s: (b, 0, s, 0)),
        ),
        compiler_params=pltpu.CompilerParams(
            dimension_semantics=("parallel", "parallel"),
            vmem_limit_bytes=vmem_limit,
        ),
        cost_estimate=cost,
    )(x4)

    out = out.reshape(B, C, hw_pad)
    if hw_pad != HW:
        out = out[:, :, :HW]
    return out.reshape(B, C, H, W)


def _taylor_softmax_ref(x, dim=1, n=2):
    # Pure-JAX reference mirroring the PyTorch forward exactly.
    fn = jnp.ones_like(x)
    denor = 1.0
    for i in range(1, n + 1):
        denor *= i
        fn = fn + jnp.power(x, i) / denor
    return fn / jnp.sum(fn, axis=dim, keepdims=True)


if __name__ == "__main__":
    key = jax.random.PRNGKey(0)
    x = jax.random.normal(key, (2, 4, 16, 16), dtype=jnp.float32)

    out = jax.block_until_ready(taylor_softmax(x, dim=1, n=2))
    ref = _taylor_softmax_ref(x, dim=1, n=2)

    assert out.shape == x.shape
    assert out.dtype == x.dtype
    assert jnp.allclose(out, ref, atol=1e-5, rtol=1e-5), "mismatch vs reference"
    print("KERNEL_OK")
</pallas_src>

<mosaic_0001>
module attributes {stable_mosaic.version = 11 : i64} {
  func.func @_taylor_softmax_kernel(%arg0: i32, %arg1: i32, %arg2: memref<1x4x2x128xf32, #tpu.memory_space<vmem>>, %arg3: memref<1x4x2x128xf32, #tpu.memory_space<vmem>>) attributes {dimension_semantics = [#tpu.dimension_semantics<parallel>, #tpu.dimension_semantics<parallel>], iteration_bounds = array<i64: 2, 1>, scalar_prefetch = 0 : i64, scratch_operands = 0 : i64, tpu.core_type = #tpu.core_type<tc>, window_params = [{transform_indices = @transform_0, window_bounds = array<i64: 1, 4, 2, 128>}, {transform_indices = @transform_1, window_bounds = array<i64: 1, 4, 2, 128>}]} {
    %c0 = arith.constant 0 : index
    %c0_0 = arith.constant 0 : index
    %c0_1 = arith.constant 0 : index
    %c0_2 = arith.constant 0 : index
    %0 = vector.load %arg2[%c0, %c0_0, %c0_1, %c0_2] : memref<1x4x2x128xf32, #tpu.memory_space<vmem>>, vector<1x4x2x128xf32>
    %cst = arith.constant 5.000000e-01 : f32
    %1 = vector.broadcast %cst : f32 to vector<1x4x2x128xf32>
    %2 = arith.mulf %1, %0 : vector<1x4x2x128xf32>
    %cst_3 = arith.constant 1.000000e+00 : f32
    %3 = vector.broadcast %cst_3 : f32 to vector<1x4x2x128xf32>
    %4 = arith.addf %2, %3 : vector<1x4x2x128xf32>
    %5 = arith.mulf %0, %4 : vector<1x4x2x128xf32>
    %cst_4 = arith.constant 1.000000e+00 : f32
    %6 = vector.broadcast %cst_4 : f32 to vector<1x4x2x128xf32>
    %7 = arith.addf %5, %6 : vector<1x4x2x128xf32>
    %cst_5 = arith.constant dense<0.000000e+00> : vector<1x2x128xf32>
    %8 = vector.multi_reduction <add>, %7, %cst_5 [1] : vector<1x4x2x128xf32> to vector<1x2x128xf32>
    %9 = vector.shape_cast %8 : vector<1x2x128xf32> to vector<1x1x2x128xf32>
    %10 = tpu.reciprocal %9 {approx = true} : vector<1x1x2x128xf32> -> vector<1x1x2x128xf32>
    %11 = arith.mulf %9, %10 : vector<1x1x2x128xf32>
    %cst_6 = arith.constant 2.000000e+00 : f32
    %12 = vector.broadcast %cst_6 : f32 to vector<1x1x2x128xf32>
    %13 = arith.subf %12, %11 : vector<1x1x2x128xf32>
    %14 = arith.mulf %10, %13 : vector<1x1x2x128xf32>
    %15 = vector.broadcast %14 : vector<1x1x2x128xf32> to vector<1x4x2x128xf32>
    %16 = arith.mulf %7, %15 : vector<1x4x2x128xf32>
    %c0_7 = arith.constant 0 : index
    %c0_8 = arith.constant 0 : index
    %c0_9 = arith.constant 0 : index
    %c0_10 = arith.constant 0 : index
    %17 = vector.load %arg3[%c0_7, %c0_8, %c0_9, %c0_10] : memref<1x4x2x128xf32, #tpu.memory_space<vmem>>, vector<1x4x2x128xf32>
    tpu.vector_store %arg3[%c0_7, %c0_8, %c0_9, %c0_10], %16 {strides = array<i32>} : memref<1x4x2x128xf32, #tpu.memory_space<vmem>>, vector<1x4x2x128xf32>,
    return
  }
  func.func @transform_0(%arg0: i32, %arg1: i32) -> (i32, i32, i32, i32) {
    %c0_i32 = arith.constant 0 : i32
    %c0_i32_0 = arith.constant 0 : i32
    %c0_i32_1 = arith.constant 0 : i32
    return %arg0, %c0_i32, %arg1, %c0_i32_0 : i32, i32, i32, i32
  }
  func.func @transform_1(%arg0: i32, %arg1: i32) -> (i32, i32, i32, i32) {
    %c0_i32 = arith.constant 0 : i32
    %c0_i32_0 = arith.constant 0 : i32
    %c0_i32_1 = arith.constant 0 : i32
    return %arg0, %c0_i32, %arg1, %c0_i32_0 : i32, i32, i32, i32
  }
}

</mosaic_0001>

<bundles_post_ra>
// kernel: tpu_custom_call.1
= control target key start
LH: loop header
LB: loop body
LE: loop exit
PB: predicated region body
PF: predicated region fallthrough
CT: control target
= control target key end

     0   :  { %6 = vsyncpa [#allocation3], 0  ;;  %s653_s0 = inlined_call_operand.hbm [shape: f32[2,4,2,128], index: 0, kind: input, shape index: {}]   ;;  %s654_s1 = inlined_call_operand.hbm [shape: f32[2,4,2,128], index: 1, kind: output, shape index: {}]  }
   0x1   :  { %8 = vsyncpa [#allocation3 + $0x1], 0 }
   0x2   :  { %9 = vsyncpa [#allocation4], 0 }
   0x3   :  { %11 = vsyncpa [#allocation4 + $0x1], 0  ;;  %s503_s6 = smov 0   ;;  %s505_s7 = smov 0  }
   0x4   :  { %s507_s8 = smov 0   ;;  %s509_s9 = smov 0  }
   0x5   :  { %s511_s10 = smov 0   ;;  %s513_s11 = smov 0  }
   0x6 LB: > { %s292_s12 = sadd.s32 4294967295, %s485_s11   ;;  %s293_s13 = sadd.s32 4294967294, %s485_s11   ;;  %s485_s11 = sphi %s513_s11, %s17_s11   ;;  %s481_s10 = sphi %s511_s10, %s665_s10   ;;  %s477_s9 = sphi %s509_s9, %s664_s9   ;;  %s473_s8 = sphi %s507_s8, %s663_s8   ;;  %s469_s7 = sphi %s505_s7, %s662_s7   ;;  %s465_s6 = sphi %s503_s6, %s661_s6  }
   0x7   : > { %s29_s14 = sadd.s32 1, %s481_s10  ;;  %s38_s15 = sadd.s32 1, %s473_s8 }
   0x8   : > { %p31_p0 = scmp.ge.s32.totalorder %s29_s14, 2  ;;  %p45_p1 = scmp.ne.s32.totalorder %s473_s8, %s469_s7 }
   0x9   : > { %p46_p2 = scmp.eq.s32.totalorder %s485_s11, 0  ;;  %p51_p3 = scmp.ne.s32.totalorder %s469_s7, %s465_s6 }
   0xa   : > { %s667_s14 = smov (%p31_p0, %s29_s14), 0  ;;  %p52_p5 = scmp.eq.s32.totalorder %s292_s12, 0 }
   0xb   : > { %p544_p4 = por %p46_p2, %p45_p1  ;;  %s33_s17 = ssub.s32 %s481_s10, %s667_s14 }
   0xc   : > { %p77_p6 = scmp.eq.s32.totalorder %s292_s12, 1  ;;  %p36_p7 = scmp.eq.s32.totalorder %s33_s17, 0 }
   0xd   : > { %p550_p8 = por %p52_p5, %p51_p3  ;;  %p83_p10 = scmp.eq.s32.totalorder %s293_s13, 1 }
   0xe   : > { %p554_p9 = por %p77_p6, %p45_p1  ;;  %p321_p13 = scmp.lt.s32.totalorder %s485_s11, 2 }
   0xf   : > { %s559_s20 = scalar_select %p36_p7, %s473_s8, %s38_s15  }
  0x10   : > { %p561_p11 = por %p83_p10, %p51_p3  ;;  %s103_s22 = sand.u32 1, %s473_s8  }
  0x11   : > { %s296_s23 = sshll.u32 %s103_s22, 3  ;;  %s307_s24 = sshll.u32 %s481_s10, 7 }
  0x12   : > { %s114_s27 = scalar_lea.hbm %s653_s0, %s307_s24  ;;  %s107_s28 = scalar_lea.vmem [#allocation2], %s296_s23 }
  0x13   : > { %s115_s29 = sshll.u32 %s107_s28, 4  ;;  %p574_p0 = pnand %p321_p13, %p544_p4  ;;  %s116_s29 = int_to_ptr.vmem [resolvable:$true] %s115_s29 }
  0x14   : > { %p299_p1 = scmp.ge.s32.totalorder %s485_s11, 1  ;;  %s104_s2 = scalar_lea.sflag [#allocation3], %s103_s22 }
  0x15   : > { %p379_p2 = pneg %p574_p0  ;;  %s390_s3 = scalar_lea.vmem %s116_s29, 128 }
  0x16   : > { %p391_p3 = scmp.ne.s32.totalorder %s116_s29, %s390_s3  ;;  %s487_s4 = smov [#allocation2]  }
  0x17   : > { %s395_s5 = sshll.u32 %s487_s4, 4  ;;  %s396_s5 = int_to_ptr.vmem [resolvable:$false] %s395_s5 }
  0x18   : > { %p393_p5 = pnand %p391_p3, %p379_p2  ;;  %s397_s12 = scalar_lea.vmem %s396_s5, 256 }
  0x19   : > { %p398_p7 = scmp.lt.s32.totalorder %s116_s29, %s396_s5  ;;  %p399_p10 = scmp.lt.s32.totalorder %s397_s12, %s390_s3 }
  0x1a   : > { %p394_p6 = pneg %p393_p5 }
  0x1b   : > { %p400_p12 = por %p399_p10, %p398_p7 }
  0x1d   : > { %p401_p4 = pnand %p400_p12, %p394_p6 }
  0x1f   : > { %404 = shalt.err (!%p401_p4)
}
  0x20   : > { %s488_s13 = smov 32   ;;  %s489_s15 = smov 2  }
  0x21   : > { %316 = dma.hbm_to_vmem [thread:$0]  (!%p574_p0), %s114_s27, 128, %s116_s29, %s104_s2, %s488_s13, %s488_s13, %s489_s15  }
  0x22   : > { %p123_p13 = scmp.lt.s32.totalorder %s485_s11, 3 }
  0x24   : > { %p124_p2 = pnand %p299_p1, %p123_p13 }
  0x25   : > { %s587_s16 = sand.u32 (!%p124_p2), 1, %s469_s7  }
  0x26   : > { %127 = sbr.rel (%p124_p2) target bundleno = 97 (0x61), region = 24  ;;  %s300_s17 = sshll.u32 (!%p124_p2), %s587_s16, 3 }
  0x27   : > { %s130_s22 = scalar_lea.sflag (!%p124_p2), [#allocation3], %s587_s16  ;;  %s133_s23 = scalar_lea.vmem (!%p124_p2), [#allocation2], %s300_s17 }
  0x2b   : > { %456 = dma.done.wait (%p550_p8), %s130_s22, 128  }
  0x2c   : > { %458 = vsyncadd (%p550_p8), %s130_s22, 4294967168  ;;  %v152_v0 = vld [vmem:[%s133_s23] sm:$0x3]  ;;  %v153_v1 = vld [vmem:[%s133_s23 + $0x2] sm:$0x3]  ;;  %vm172_vm0 = vcmask 1041408  }
  0x2d   : > { %v154_v2 = vld [vmem:[%s133_s23 + $0x4] sm:$0x3]  ;;  %v155_v3 = vld [vmem:[%s133_s23 + $0x6] sm:$0x3]  ;;  %v156_v4 = vmul.f32 0.5, %v152_v0  ;;  %v157_v5 = vmul.f32 0.5, %v153_v1 }
  0x2e   : > { %v158_v6 = vmul.f32 0.5, %v154_v2  ;;  %v159_v7 = vmul.f32 0.5, %v155_v3  ;;  %s151_s18 = scalar_lea.vmem [#allocation5], %s300_s17  ;;  %s308_s25 = sshll.u32 %s477_s9, 7 }
  0x2f   : > { %v160_v8 = vadd.f32 1.0, %v156_v4  ;;  %v161_v9 = vadd.f32 1.0, %v157_v5  ;;  %s207_s24 = sshll.u32 %s151_s18, 4  ;;  %s605_s28 = scalar_lea.hbm %s654_s1, %s308_s25  ;;  %s600_s24 = int_to_ptr.vmem [resolvable:$true] %s207_s24 }
  0x30   : > { %v162_v10 = vadd.f32 1.0, %v158_v6  ;;  %v163_v11 = vadd.f32 1.0, %v159_v7  ;;  %s193_s9 = scalar_lea.sflag [#allocation4], %s587_s16  ;;  %s405_s29 = scalar_lea.vmem %s600_s24, 128 }
  0x31   : > { %v164_v12 = vmul.f32 %v160_v8, %v152_v0  ;;  %v165_v13 = vmul.f32 %v161_v9, %v153_v1  ;;  %p406_p8 = scmp.ne.s32.totalorder %s600_s24, %s405_s29  ;;  %s490_s30 = smov [#allocation5]  }
  0x32   : > { %v166_v14 = vmul.f32 %v162_v10, %v154_v2  ;;  %v167_v15 = vmul.f32 %v163_v11, %v155_v3  ;;  %s409_s2 = sshll.u32 %s490_s30, 4  ;;  %s410_s2 = int_to_ptr.vmem [resolvable:$false] %s409_s2 }
  0x33   : > { %v168_v16 = vadd.f32 1.0, %v164_v12  ;;  %v169_v17 = vadd.f32 1.0, %v165_v13  ;;  %p407_p12 = pnand %p406_p8, %p554_p9  ;;  %s411_s3 = scalar_lea.vmem %s410_s2, 256 }
  0x34   : > { %v170_v18 = vadd.f32 1.0, %v166_v14  ;;  %v171_v19 = vadd.f32 1.0, %v167_v15  ;;  %p412_p1 = scmp.lt.s32.totalorder %s600_s24, %s410_s2  ;;  %p413_p3 = scmp.lt.s32.totalorder %s411_s3, %s405_s29 }
  0x35   : > { %v173_v20 = vsel %vm172_vm0, %v168_v16, 0.0  ;;  %v174_v21 = vsel %vm172_vm0, %v169_v17, 0.0  ;;  %p408_p0 = pneg %p407_p12 }
  0x36   : > { %v176_v22 = vsel %vm172_vm0, %v170_v18, 0.0  ;;  %v175_v23 = vadd.f32 %v174_v21, %v173_v20  ;;  %v178_v24 = vsel %vm172_vm0, %v171_v19, 0.0  ;;  %p414_p5 = por %p413_p3, %p412_p1 }
  0x38   : > { %v177_v25 = vadd.f32 %v176_v22, %v175_v23  ;;  %p415_p6 = pnand %p414_p5, %p408_p0 }
  0x3a   : > { %v179_v26 = vadd.f32 %v178_v24, %v177_v25 }
  0x3c   : > { %375 = vrcp.f32 %v179_v26 }
  0x49   : > { %v376_v27 = vpop.eup %375 }
  0x4a   : > { %v181_v28 = vmul.f32 %v376_v27, %v179_v26 }
  0x4c   : > { %v182_v29 = vsub.f32 2.0, %v181_v28 }
  0x4e   : > { %v183_v30 = vmul.f32 %v376_v27, %v182_v29 }
  0x50   : > { %v184_v31 = vmul.f32 %v183_v30, %v168_v16  ;;  %v185_v32 = vmul.f32 %v183_v30, %v169_v17  ;;  %v186_v33 = vmul.f32 %v183_v30, %v170_v18  ;;  %v187_v34 = vmul.f32 %v183_v30, %v171_v19 }
  0x52   : > { %188 = vst [vmem:[%s151_s18] sm:$0x3] %v184_v31  ;;  %189 = vst [vmem:[%s151_s18 + $0x2] sm:$0x3] %v185_v32 }
  0x53   : > { %190 = vst [vmem:[%s151_s18 + $0x4] sm:$0x3] %v186_v33  ;;  %191 = vst [vmem:[%s151_s18 + $0x6] sm:$0x3] %v187_v34 }
  0x54   : > { %418 = shalt.err (!%p415_p6)
}
  0x55   : > { %s419_s4 = scalar_lea.hbm %s605_s28, 128  ;;  %s423_s13 = scalar_lea.hbm %s654_s1, 256 }
  0x56   : > { %p420_p7 = scmp.ne.s32.totalorder %s605_s28, %s419_s4  ;;  %p424_p13 = scmp.lt.s32.totalorder %s605_s28, %s654_s1 }
  0x57   : > { %p425_p2 = scmp.lt.s32.totalorder %s423_s13, %s419_s4 }
  0x58   : > { %p421_p10 = pnand %p420_p7, %p554_p9 }
  0x59   : > { %p426_p8 = por %p425_p2, %p424_p13 }
  0x5a   : > { %p422_p4 = pneg %p421_p10 }
  0x5c   : > { %p427_p12 = pnand %p426_p8, %p422_p4 }
  0x5e   : > { %430 = shalt.err (!%p427_p12)
}
  0x5f   : > { %s491_s22 = smov 32   ;;  %s492_s23 = smov 2  }
  0x60   : > { %311 = dma.vmem_to_hbm [thread:$0]  (%p554_p9), %s600_s24, 128, %s605_s28, %s193_s9, %s491_s22, %s491_s22, %s492_s23  }
  0x61 PF: > { %s222_s18 = sand.u32 1, %s465_s6   ;;  %p660_p0 = scmp.ge.s32.totalorder %s485_s11, 2 }
  0x62   : > { %s223_s25 = scalar_lea.sflag [#allocation4], %s222_s18 }
  0x63   : > { %p318_p1 = pnand %p660_p0, %p561_p11 }
  0x65   : > { %p319_p3 = pneg %p318_p1 }
  0x67   : > { %460 = dma.done.wait (%p319_p3), %s223_s25, 128  }
  0x68   : > { %462 = vsyncadd (%p319_p3), %s223_s25, 4294967168  ;;  %s17_s11 = sadd.s32 1, %s485_s11   ;;  %s661_s6 = smov %s469_s7 }
  0x69   : > { %p14_p5 = scmp.ge.s32.totalorder %s17_s11, 4   ;;  %s662_s7 = smov %s473_s8 }
  0x6a   : > { %s663_s8 = smov %s559_s20  ;;  %s664_s9 = smov %s481_s10 }
  0x6b   : > { %s665_s10 = smov %s667_s14  ;;  %16 = sbr.rel (!%p14_p5) target bundleno = 6 (0x6), region = 69 }
  0x70   :  { %228 = vsyncpa [#allocation3], 1 }
  0x71   :  { %230 = vsyncpa [#allocation3 + $0x1], 1 }
  0x72   :  { %231 = vsyncpa [#allocation4], 1 }
  0x73   :  { %233 = vsyncpa [#allocation4 + $0x1], 1 }

</bundles_post_ra>
